<compile_context>
chip_gen: v7x
topology: tpu7x:2x2x1
jax: 0.10.0
libtpu: 0.0.40
codegen_flags: <defaults>
</compile_context>

<pallas_src>
import jax
import jax.numpy as jnp
from jax.experimental import pallas as pl
from jax.experimental.pallas import tpu as pltpu


def _concat_pool_linear_kernel(x_ref, w_ref, out_ref):
    # x_ref : (TB, S, C)  VMEM -- backbone feature tile, channels on lanes
    # w_ref : (2, C)      VMEM -- row 0: Linear weights for the avg-pool half,
    #                             row 1: Linear weights for the max-pool half
    # out   : (TB, 1)     VMEM
    x = x_ref[...].astype(jnp.float32)

    # AdaptiveAvgPool2d((1,1)) / AdaptiveMaxPool2d((1,1)) == reductions over S=H*W
    # (sublane axis; lanes stay dense in C).
    avg = jnp.mean(x, axis=1)            # (TB, C)
    mx = jnp.max(x, axis=1)              # (TB, C)

    w = w_ref[...].astype(jnp.float32)
    w_avg = w[0:1, :]                    # (1, C)
    w_max = w[1:2, :]                    # (1, C)

    # cat([avg, max], dim=1) @ W.T  ==  sum(avg*W[:, :C] + max*W[:, C:], lanes)
    # (bias is added in the wrapper). VPU multiply + XLU lane reduce; no MXU.
    out_ref[...] = jnp.sum(avg * w_avg + mx * w_max, axis=-1, keepdims=True)


def _pick_batch_tile(B, S, C, itemsize, budget_bytes=28 * 1024 * 1024):
    """Largest multiple-of-8 batch tile whose double-buffered input fits the budget."""
    s_pad = -(-S // 8) * 8          # sublane padding
    c_pad = -(-C // 128) * 128      # lane padding
    per_row = s_pad * c_pad * itemsize
    tb = budget_bytes // (2 * per_row)          # 2 = input double buffering
    tb = int(max(8, min(tb, 64)))
    tb = (tb // 8) * 8                          # output block needs TB % 8 == 0
    b_ceil = -(-B // 8) * 8
    return max(8, min(tb, b_ceil))


def model_forward(h, w, b, *, batch_tile=None, channels_last=False):
    """Head of `Model`.

    h: backbone feature map, (B, C, H, W) NCHW (PyTorch layout) or
       (B, H, W, C) if channels_last=True.  Native dtype (f32 or bf16).
    w: (1, 2C) torch-style nn.Linear weight.
    b: (1,) bias.
    Returns (B,) logits in float32.
    """
    if channels_last:
        B, H, W, C = h.shape
        x = h.reshape(B, H * W, C)                          # already channels-on-lanes
    else:
        B, C, H, W = h.shape
        # TODO(synk): ideally the JAX backbone emits NHWC so this transpose disappears.
        x = jnp.transpose(h.reshape(B, C, H * W), (0, 2, 1))  # (B, S, C)
    S = H * W

    # Fused, lane-dense weight: row 0 acts on the avg half, row 1 on the max half.
    w2 = jnp.stack([w[0, :C], w[0, C:]], axis=0)            # (2, C), native dtype

    itemsize = jnp.dtype(x.dtype).itemsize
    tb = batch_tile if batch_tile is not None else _pick_batch_tile(B, S, C, itemsize)
    n_tiles = pl.cdiv(B, tb)
    b_pad = n_tiles * tb
    if b_pad != B:
        # Padded rows only produce garbage logits for themselves (per-row
        # reductions, no cross-row mixing); they are sliced away below.
        x = jnp.pad(x, ((0, b_pad - B), (0, 0), (0, 0)))

    bytes_accessed = b_pad * S * C * itemsize + w2.size * itemsize + b_pad * 4
    flops = 3 * b_pad * S * C + 4 * b_pad * C               # mean+max+fma-ish, advisory

    out = pl.pallas_call(
        _concat_pool_linear_kernel,
        out_shape=jax.ShapeDtypeStruct((b_pad, 1), jnp.float32),
        grid=(n_tiles,),
        in_specs=[
            pl.BlockSpec((tb, S, C), lambda i: (i, 0, 0)),   # batch-tiled feature stream
            pl.BlockSpec((2, C), lambda i: (0, 0)),          # small resident weight
        ],
        out_specs=pl.BlockSpec((tb, 1), lambda i: (i, 0)),
        compiler_params=pltpu.CompilerParams(
            dimension_semantics=("parallel",),               # independent batch tiles
            vmem_limit_bytes=48 * 1024 * 1024,
        ),
        cost_estimate=pl.CostEstimate(
            flops=flops, transcendentals=0, bytes_accessed=bytes_accessed
        ),
    )(x, w2)

    # + bias, slice off batch padding, .squeeze(1): (B,1) -> (B,)
    return out[:B, 0] + b.astype(jnp.float32)[0]


if __name__ == "__main__":
    key = jax.random.PRNGKey(0)
    kx, kw, kb = jax.random.split(key, 3)

    # Small feature-map shapes consistent with the head:
    # B=2, C_feature=32 (stand-in for 2048), spatial 4x4.
    B, C, H, W = 2, 32, 4, 4
    h = jax.random.normal(kx, (B, C, H, W), dtype=jnp.float32)

    # Deterministic nn.Linear(2C, 1)-style init: U(-1/sqrt(fan_in), 1/sqrt(fan_in))
    fan_in = 2 * C
    bound = 1.0 / (fan_in ** 0.5)
    w = jax.random.uniform(kw, (1, 2 * C), jnp.float32, -bound, bound)
    b = jax.random.uniform(kb, (1,), jnp.float32, -bound, bound)

    logits = model_forward(h, w, b)
    logits = jax.block_until_ready(logits)

    # Pure-JAX reference of the head for a correctness gate.
    avg_ref = h.mean(axis=(2, 3))
    max_ref = h.max(axis=(2, 3))
    ref = (jnp.concatenate([avg_ref, max_ref], axis=1) @ w.T + b)[:, 0]

    assert logits.shape == (B,), logits.shape
    assert jnp.allclose(logits, ref, atol=1e-5, rtol=1e-5), (logits, ref)
    print("KERNEL_OK")
</pallas_src>

<mosaic_0001>
module attributes {stable_mosaic.version = 11 : i64} {
  func.func @_concat_pool_linear_kernel(%arg0: i32, %arg1: memref<8x16x32xf32, #tpu.memory_space<vmem>>, %arg2: memref<2x32xf32, #tpu.memory_space<vmem>>, %arg3: memref<8x1xf32, #tpu.memory_space<vmem>>) attributes {dimension_semantics = [#tpu.dimension_semantics<parallel>], iteration_bounds = array<i64: 1>, scalar_prefetch = 0 : i64, scratch_operands = 0 : i64, tpu.core_type = #tpu.core_type<tc>, window_params = [{transform_indices = @transform_0, window_bounds = array<i64: 8, 16, 32>}, {pipeline_mode = #tpu.pipeline_mode<synchronous>, transform_indices = @transform_1, window_bounds = array<i64: 2, 32>}, {transform_indices = @transform_2, window_bounds = array<i64: 8, 1>}]} {
    %c0 = arith.constant 0 : index
    %c0_0 = arith.constant 0 : index
    %c0_1 = arith.constant 0 : index
    %0 = vector.load %arg1[%c0, %c0_0, %c0_1] : memref<8x16x32xf32, #tpu.memory_space<vmem>>, vector<8x16x32xf32>
    %cst = arith.constant dense<0.000000e+00> : vector<8x32xf32>
    %1 = vector.multi_reduction <add>, %0, %cst [1] : vector<8x16x32xf32> to vector<8x32xf32>
    %cst_2 = arith.constant 1.600000e+01 : f32
    %2 = vector.broadcast %cst_2 : f32 to vector<8x32xf32>
    %3 = arith.divf %1, %2 : vector<8x32xf32>
    %cst_3 = arith.constant dense<0xFF800000> : vector<8x32xf32>
    %4 = vector.multi_reduction <maximumf>, %0, %cst_3 [1] : vector<8x16x32xf32> to vector<8x32xf32>
    %c0_4 = arith.constant 0 : index
    %c0_5 = arith.constant 0 : index
    %5 = vector.load %arg2[%c0_4, %c0_5] : memref<2x32xf32, #tpu.memory_space<vmem>>, vector<2x32xf32>
    %6 = vector.extract_strided_slice %5 {offsets = [0, 0], sizes = [1, 32], strides = [1, 1]} : vector<2x32xf32> to vector<1x32xf32>
    %7 = vector.extract_strided_slice %5 {offsets = [1, 0], sizes = [1, 32], strides = [1, 1]} : vector<2x32xf32> to vector<1x32xf32>
    %8 = vector.broadcast %6 : vector<1x32xf32> to vector<8x32xf32>
    %9 = arith.mulf %3, %8 : vector<8x32xf32>
    %10 = vector.broadcast %7 : vector<1x32xf32> to vector<8x32xf32>
    %11 = arith.mulf %4, %10 : vector<8x32xf32>
    %12 = arith.addf %9, %11 : vector<8x32xf32>
    %cst_6 = arith.constant dense<0.000000e+00> : vector<8xf32>
    %13 = vector.multi_reduction <add>, %12, %cst_6 [1] : vector<8x32xf32> to vector<8xf32>
    %14 = vector.shape_cast %13 : vector<8xf32> to vector<8x1xf32>
    %c0_7 = arith.constant 0 : index
    %c0_8 = arith.constant 0 : index
    %15 = vector.load %arg3[%c0_7, %c0_8] : memref<8x1xf32, #tpu.memory_space<vmem>>, vector<8x1xf32>
    tpu.vector_store %arg3[%c0_7, %c0_8], %14 {strides = array<i32>} : memref<8x1xf32, #tpu.memory_space<vmem>>, vector<8x1xf32>,
    return
  }
  func.func @transform_0(%arg0: i32) -> (i32, i32, i32) {
    %c0_i32 = arith.constant 0 : i32
    %c0_i32_0 = arith.constant 0 : i32
    %c0_i32_1 = arith.constant 0 : i32
    return %arg0, %c0_i32, %c0_i32_0 : i32, i32, i32
  }
  func.func @transform_1(%arg0: i32) -> (i32, i32) {
    %c0_i32 = arith.constant 0 : i32
    %c0_i32_0 = arith.constant 0 : i32
    %c0_i32_1 = arith.constant 0 : i32
    return %c0_i32, %c0_i32_0 : i32, i32
  }
  func.func @transform_2(%arg0: i32) -> (i32, i32) {
    %c0_i32 = arith.constant 0 : i32
    %c0_i32_0 = arith.constant 0 : i32
    return %arg0, %c0_i32 : i32, i32
  }
}

</mosaic_0001>

<bundles_post_ra>
// kernel: tpu_custom_call.1
= control target key start
LH: loop header
LB: loop body
LE: loop exit
PB: predicated region body
PF: predicated region fallthrough
CT: control target
= control target key end

     0   :  { %7 = vsyncpa [#allocation3], 0  ;;  %s295_s9 = smov [#allocation2]   ;;  %s457_s0 = inlined_call_operand.hbm [shape: f32[8,16,32], index: 0, kind: input, shape index: {}]   ;;  %s458_s1 = inlined_call_operand.vmem [shape: f32[2,32], index: 1, kind: input, shape index: {}]   ;;  %s459_s2 = inlined_call_operand.vmem [shape: f32[8,1], index: 2, kind: output, shape index: {}]  }
   0x1   :  { %s13_s10 = sshll.u32 %s295_s9, 4  ;;  %s271_s13 = scalar_lea.hbm %s457_s0, 2048  ;;  %s14_s10 = int_to_ptr.vmem [resolvable:$true] %s13_s10 }
   0x2   :  { %p272_p0 = scmp.ne.s32.totalorder %s457_s0, %s271_s13  ;;  %p275_p1 = scmp.lt.u32.totalorder %s271_s13, %s457_s0 }
   0x4   :  { %p277_p2 = pnand %p275_p1, %p272_p0 }
   0x6   :  { %280 = shalt.err (!%p277_p2)
}
   0x7   :  { %s281_s18 = scalar_lea.vmem %s14_s10, 2048  ;;  %p286_p4 = scmp.lt.s32.totalorder %s14_s10, %s14_s10 }
   0x8   :  { %p282_p3 = scmp.ne.s32.totalorder %s14_s10, %s281_s18  ;;  %p287_p5 = scmp.lt.s32.totalorder %s281_s18, %s281_s18 }
   0xa   :  { %p288_p6 = por %p287_p5, %p286_p4 }
   0xc   :  { %p289_p7 = pnand %p288_p6, %p282_p3 }
   0xe   :  { %292 = shalt.err (!%p289_p7)
}
   0xf   :  { %s296_s19 = smov 128   ;;  %s297_s20 = smov 8  }
  0x10   :  { %19 = dma.hbm_to_vmem [thread:$0]  %s457_s0, 2048, %s14_s10, [#allocation3], %s296_s19, %s296_s19, %s297_s20  }
  0x11   :  { %293 = dma.done.wait [#allocation3], 2048  }
  0x12   :  { %294 = vsyncadd [#allocation3], 4294965248  ;;  %v196_v0 = vlaneseq  ;;  %vm41_vm0 = vcmask 261120   ;;  %v327_v2 = vld [vmem:[#allocation2] sm:$0xff]  ;;  %v329_v3 = vld [vmem:[#allocation2 + $0x8] sm:$0xff]  ;;  %vm237_vm1 = vcmask 1041409  }
  0x13   :  { %v331_v4 = vld [vmem:[#allocation2 + $0x10] sm:$0xff]  ;;  %v334_v6 = vld [vmem:[#allocation2 + $0x18] sm:$0xff]  ;;  %v336_v7 = vld [vmem:[#allocation2 + $0x20] sm:$0xff]  ;;  %v42_v9 = vsel %vm41_vm0, %v327_v2, 0.0  ;;  %v43_v10 = vsel %vm41_vm0, %v329_v3, 0.0  ;;  %vm240_vm2 = vcmask 1042434  }
  0x14   :  { %v325_v1 = vshrl.u32 %v196_v0, 7  ;;  %v338_v8 = vld [vmem:[#allocation2 + $0x28] sm:$0xff]  ;;  %v51_v11 = vsel %vm41_vm0, %v331_v4, 0.0  ;;  %v346_v12 = vld [vmem:[#allocation2 + $0x30] sm:$0xff]  ;;  %v348_v13 = vld [vmem:[#allocation2 + $0x38] sm:$0xff]  ;;  %v44_v15 = vadd.f32 %v43_v10, %v42_v9  ;;  %v52_v16 = vsel %vm41_vm0, %v334_v6, 0.0 }
  0x15   :  { %v350_v14 = vld [vmem:[#allocation2 + $0x40] sm:$0xff]  ;;  %v60_v17 = vsel %vm41_vm0, %v336_v7, 0.0  ;;  %v61_v18 = vsel %vm41_vm0, %v338_v8, 0.0  ;;  %v358_v19 = vld [vmem:[#allocation2 + $0x48] sm:$0xff]  ;;  %v360_v20 = vld [vmem:[#allocation2 + $0x50] sm:$0xff]  ;;  %v53_v22 = vadd.f32 %v52_v16, %v51_v11  ;;  %v69_v24 = vsel %vm41_vm0, %v346_v12, 0.0 }
  0x16   :  { %v198_v5 = vsub.s32 0, %v325_v1  ;;  %v362_v21 = vld [vmem:[#allocation2 + $0x58] sm:$0xff]  ;;  %v62_v23 = vadd.f32 %v61_v18, %v60_v17  ;;  %v70_v25 = vsel %vm41_vm0, %v348_v13, 0.0  ;;  %v368_v26 = vld [vmem:[#allocation2 + $0x60] sm:$0xff]  ;;  %v45_v27 = vrot.slane %v44_v15, 4  ;;  %v374_v31 = vld [vmem:[#allocation2 + $0x68] sm:$0xff] }
  0x17   :  { %v71_v28 = vadd.f32 %v70_v25, %v69_v24  ;;  %v78_v29 = vsel %vm41_vm0, %v350_v14, 0.0  ;;  %v79_v30 = vsel %vm41_vm0, %v358_v19, 0.0  ;;  %v376_v32 = vld [vmem:[#allocation2 + $0x70] sm:$0xff]  ;;  %v54_v33 = vrot.slane %v53_v22, 4  ;;  %v384_v41 = vld [vmem:[#allocation2 + $0x78] sm:$0xff] }
  0x18   :  { %v63_v34 = vrot.slane %v62_v23, 4  ;;  %v80_v35 = vadd.f32 %v79_v30, %v78_v29  ;;  %v87_v36 = vsel %vm41_vm0, %v360_v20, 0.0  ;;  %v46_v37 = vadd.f32 %v45_v27, %v44_v15 }
  0x19   :  { %v72_v38 = vrot.slane %v71_v28, 4  ;;  %v88_v39 = vsel %vm41_vm0, %v362_v21, 0.0  ;;  %v96_v40 = vsel %vm41_vm0, %v368_v26, 0.0  ;;  %v55_v42 = vadd.f32 %v54_v33, %v53_v22 }
  0x1a   :  { %v64_v43 = vadd.f32 %v63_v34, %v62_v23  ;;  %v81_v44 = vrot.slane %v80_v35, 4  ;;  %v89_v45 = vadd.f32 %v88_v39, %v87_v36  ;;  %v47_v46 = vrot.slane %v46_v37, 2 }
  0x1b   :  { %v73_v47 = vadd.f32 %v72_v38, %v71_v28  ;;  %v97_v48 = vsel %vm41_vm0, %v374_v31, 0.0  ;;  %v105_v49 = vsel %vm41_vm0, %v376_v32, 0.0  ;;  %v56_v50 = vrot.slane %v55_v42, 2 }
  0x1c   :  { %v65_v51 = vrot.slane %v64_v43, 2  ;;  %v82_v52 = vadd.f32 %v81_v44, %v80_v35  ;;  %v90_v53 = vrot.slane %v89_v45, 4  ;;  %v48_v54 = vadd.f32 %v47_v46, %v46_v37 }
  0x1d   :  { %v74_v55 = vrot.slane %v73_v47, 2  ;;  %v98_v56 = vadd.f32 %v97_v48, %v96_v40  ;;  %v106_v57 = vsel %vm41_vm0, %v384_v41, 0.0  ;;  %v57_v58 = vadd.f32 %v56_v50, %v55_v42 }
  0x1e   :  { %v66_v59 = vadd.f32 %v65_v51, %v64_v43  ;;  %v83_v60 = vrot.slane %v82_v52, 2  ;;  %v91_v61 = vadd.f32 %v90_v53, %v89_v45  ;;  %v49_v62 = vrot.slane %v48_v54, 1 }
  0x1f   :  { %v75_v63 = vadd.f32 %v74_v55, %v73_v47  ;;  %v99_v0 = vrot.slane %v98_v56, 4  ;;  %v107_v9 = vadd.f32 %v106_v57, %v105_v49  ;;  %v58_v10 = vrot.slane %v57_v58, 1 }
  0x20   :  { %v67_v11 = vrot.slane %v66_v59, 1  ;;  %v84_v15 = vadd.f32 %v83_v60, %v82_v52  ;;  %v92_v16 = vrot.slane %v91_v61, 2  ;;  %v50_v17 = vadd.f32 %v49_v62, %v48_v54 }
  0x21   :  { %v76_v18 = vrot.slane %v75_v63, 1  ;;  %v100_v22 = vadd.f32 %v99_v0, %v98_v56  ;;  %v108_v23 = vrot.slane %v107_v9, 4  ;;  %v59_v24 = vadd.f32 %v58_v10, %v57_v58 }
  0x22   :  { %v68_v25 = vadd.f32 %v67_v11, %v66_v59  ;;  %v85_v27 = vrot.slane %v84_v15, 1  ;;  %v93_v28 = vadd.f32 %v92_v16, %v91_v61  ;;  %v210_v34 = vsub.s32 1, %v325_v1 }
  0x23   :  { %v77_v29 = vadd.f32 %v76_v18, %v75_v63  ;;  %v101_v30 = vrot.slane %v100_v22, 2  ;;  %v109_v33 = vadd.f32 %v108_v23, %v107_v9  ;;  %v393_v37 = vmul.f32 0.0625, %v50_v17 }
  0x24   :  { %v86_v35 = vadd.f32 %v85_v27, %v84_v15  ;;  %v94_v36 = vrot.slane %v93_v28, 1  ;;  %v395_v38 = vmul.f32 0.0625, %v59_v24  ;;  %v397_v42 = vmul.f32 0.0625, %v68_v25 }
  0x25   :  { %v102_v39 = vadd.f32 %v101_v30, %v100_v22  ;;  %v110_v40 = vrot.slane %v109_v33, 2  ;;  %v123_v43 = vsel %vm41_vm0, %v327_v2, -inf  ;;  %v401_v45 = vmul.f32 0.0625, %v77_v29 }
  0x26   :  { %v95_v44 = vadd.f32 %v94_v36, %v93_v28  ;;  %v124_v46 = vsel %vm41_vm0, %v329_v3, -inf  ;;  %v132_v47 = vsel %vm41_vm0, %v331_v4, -inf  ;;  %v133_v51 = vsel %vm41_vm0, %v334_v6, -inf }
  0x27   :  { %v103_v48 = vrot.slane %v102_v39, 1  ;;  %v111_v49 = vadd.f32 %v110_v40, %v109_v33  ;;  %v125_v50 = vmax.f32 %v123_v43, %v124_v46  ;;  %v409_v52 = vmul.f32 0.0625, %v86_v35 }
  0x28   :  { %v134_v53 = vmax.f32 %v132_v47, %v133_v51  ;;  %v141_v2 = vsel %vm41_vm0, %v336_v7, -inf  ;;  %v142_v54 = vsel %vm41_vm0, %v338_v8, -inf  ;;  %v150_v58 = vsel %vm41_vm0, %v346_v12, -inf }
  0x29   :  { %v104_v55 = vadd.f32 %v103_v48, %v102_v39  ;;  %v112_v3 = vrot.slane %v111_v49, 1  ;;  %v126_v56 = vrot.slane %v125_v50, 4  ;;  %v143_v57 = vmax.f32 %v141_v2, %v142_v54  ;;  %v195_v39 = vld [vmem:[%s458_s1] sm:$0x3] }
  0x2a   :  { %v135_v4 = vrot.slane %v134_v53, 4  ;;  %v151_v6 = vsel %vm41_vm0, %v348_v13, -inf  ;;  %v159_v59 = vsel %vm41_vm0, %v350_v14, -inf  ;;  %v421_v61 = vmul.f32 0.0625, %v95_v44 }
  0x2b   :  { %v113_v60 = vadd.f32 %v112_v3, %v111_v49  ;;  %v127_v7 = vmax.f32 %v125_v50, %v126_v56  ;;  %v144_v62 = vrot.slane %v143_v57, 4  ;;  %v152_v63 = vmax.f32 %v150_v58, %v151_v6 }
  0x2c   :  { %v136_v8 = vmax.f32 %v134_v53, %v135_v4  ;;  %v160_v0 = vsel %vm41_vm0, %v358_v19, -inf  ;;  %v168_v9 = vsel %vm41_vm0, %v360_v20, -inf  ;;  %v121_v12 = vmul.f32 0.0625, %v104_v55 }
  0x2d   :  { %v128_v10 = vrot.slane %v127_v7, 2  ;;  %v145_v11 = vmax.f32 %v143_v57, %v144_v62  ;;  %v161_v13 = vmax.f32 %v159_v59, %v160_v0  ;;  %v153_v16 = vrot.slane %v152_v63, 4 }
  0x2e   :  { %v137_v15 = vrot.slane %v136_v8, 2  ;;  %v169_v14 = vsel %vm41_vm0, %v362_v21, -inf  ;;  %v177_v17 = vsel %vm41_vm0, %v368_v26, -inf  ;;  %v178_v20 = vsel %vm41_vm0, %v374_v31, -inf }
  0x2f   :  { %v129_v18 = vmax.f32 %v127_v7, %v128_v10  ;;  %v146_v22 = vrot.slane %v145_v11, 2  ;;  %v162_v23 = vrot.slane %v161_v13, 4  ;;  %v170_v24 = vmax.f32 %v168_v9, %v169_v14 }
  0x30   :  { %v138_v19 = vmax.f32 %v136_v8, %v137_v15  ;;  %v154_v25 = vmax.f32 %v152_v63, %v153_v16  ;;  %v186_v27 = vsel %vm41_vm0, %v376_v32, -inf  ;;  %v179_v36 = vmax.f32 %v177_v17, %v178_v20 }
  0x31   :  { %v130_v28 = vrot.slane %v129_v18, 1  ;;  %v147_v29 = vmax.f32 %v145_v11, %v146_v22  ;;  %v163_v30 = vmax.f32 %v161_v13, %v162_v23  ;;  %v171_v33 = vrot.slane %v170_v24, 4 }
  0x32   :  { %v139_v21 = vrot.slane %v138_v19, 1  ;;  %v155_v35 = vrot.slane %v154_v25, 2  ;;  %v187_v26 = vsel %vm41_vm0, %v384_v41, -inf  ;;  %v122_v40 = vmul.f32 0.0625, %v113_v60 }
  0x33   :  { %v148_v43 = vrot.slane %v147_v29, 1  ;;  %v164_v31 = vrot.slane %v163_v30, 2  ;;  %v172_v44 = vmax.f32 %v170_v24, %v171_v33  ;;  %v131_v46 = vmax.f32 %v129_v18, %v130_v28 }
  0x34   :  { %v156_v32 = vmax.f32 %v154_v25, %v155_v35  ;;  %v180_v47 = vrot.slane %v179_v36, 4  ;;  %v188_v48 = vmax.f32 %v186_v27, %v187_v26  ;;  %v140_v49 = vmax.f32 %v138_v19, %v139_v21 }
  0x35   :  { %v165_v50 = vmax.f32 %v163_v30, %v164_v31  ;;  %v173_v51 = vrot.slane %v172_v44, 2  ;;  %v199_v53 = vrot.slane %v195_v39, %v198_v5  ;;  %v149_v2 = vmax.f32 %v147_v29, %v148_v43 }
  0x36   :  { %v157_v41 = vrot.slane %v156_v32, 1  ;;  %v181_v54 = vmax.f32 %v179_v36, %v180_v47  ;;  %v189_v55 = vrot.slane %v188_v48, 4  ;;  %v211_v4 = vrot.slane %v195_v39, %v210_v34 }
  0x37   :  { %v166_v3 = vrot.slane %v165_v50, 1  ;;  %v174_v56 = vmax.f32 %v172_v44, %v173_v51  ;;  %v200_v57 = vmul.f32 %v199_v53, %v393_v37  ;;  %v201_v60 = vmul.f32 %v199_v53, %v395_v38 }
  0x38   :  { %v158_v58 = vmax.f32 %v156_v32, %v157_v41  ;;  %v182_v6 = vrot.slane %v181_v54, 2  ;;  %v190_v59 = vmax.f32 %v188_v48, %v189_v55  ;;  %vm243_vm3 = vcmask 1043459  }
  0x39   :  { %v167_v5 = vmax.f32 %v165_v50, %v166_v3  ;;  %v175_v7 = vrot.slane %v174_v56, 1  ;;  %v202_v62 = vmul.f32 %v199_v53, %v397_v42  ;;  %v203_v8 = vmul.f32 %v199_v53, %v401_v45 }
  0x3a   :  { %v183_v63 = vmax.f32 %v181_v54, %v182_v6  ;;  %v191_v0 = vrot.slane %v190_v59, 2  ;;  %v204_v37 = vmul.f32 %v199_v53, %v409_v52  ;;  %v205_v1 = vmul.f32 %v199_v53, %v421_v61 }
  0x3b   :  { %v176_v34 = vmax.f32 %v174_v56, %v175_v7  ;;  %v206_v9 = vmul.f32 %v199_v53, %v121_v12  ;;  %v212_v10 = vmul.f32 %v211_v4, %v131_v46  ;;  %v213_v11 = vmul.f32 %v211_v4, %v140_v49 }
  0x3c   :  { %v184_v13 = vrot.slane %v183_v63, 1  ;;  %v192_v15 = vmax.f32 %v190_v59, %v191_v0  ;;  %v214_v38 = vmul.f32 %v211_v4, %v149_v2  ;;  %v215_v16 = vmul.f32 %v211_v4, %v158_v58 }
  0x3d   :  { %v216_v14 = vmul.f32 %v211_v4, %v167_v5  ;;  %v217_v17 = vmul.f32 %v211_v4, %v176_v34  ;;  %v220_v18 = vadd.f32 %v212_v10, %v200_v57  ;;  %v221_v42 = vadd.f32 %v213_v11, %v201_v60 }
  0x3e   :  { %v185_v22 = vmax.f32 %v183_v63, %v184_v13  ;;  %v193_v45 = vrot.slane %v192_v15, 1  ;;  %v222_v23 = vadd.f32 %v214_v38, %v202_v62  ;;  %v223_v24 = vadd.f32 %v215_v16, %v203_v8 }
  0x3f   :  { %v207_v19 = vmul.f32 %v199_v53, %v122_v40  ;;  %v224_v52 = vadd.f32 %v216_v14, %v204_v37  ;;  %v225_v25 = vadd.f32 %v217_v17, %v205_v1  ;;  %v236_v61 = vrot.slane %v221_v42, 7 }
  0x40   :  { %v194_v20 = vmax.f32 %v192_v15, %v193_v45  ;;  %v218_v12 = vmul.f32 %v211_v4, %v185_v22  ;;  %v239_v27 = vrot.slane %v222_v23, 6  ;;  %v242_v28 = vrot.slane %v223_v24, 5 }
  0x41   :  { %v238_v29 = vsel %vm237_vm1, %v236_v61, %v220_v18  ;;  %v245_v30 = vrot.slane %v224_v52, 4  ;;  %vm246_vm4 = vcmask 1044484   ;;  %v248_v33 = vrot.slane %v225_v25, 3 }
  0x42   :  { %v219_v21 = vmul.f32 %v211_v4, %v194_v20  ;;  %v226_v35 = vadd.f32 %v218_v12, %v206_v9  ;;  %v241_v36 = vsel %vm240_vm2, %v239_v27, %v238_v29  ;;  %vm249_vm5 = vcmask 1045509  }
  0x43   :  { %v244_v26 = vsel %vm243_vm3, %v242_v28, %v241_v36  ;;  %vm252_vm6 = vcmask 1046534   ;;  %vm255_vm7 = vcmask 1047559   ;;  %vm261_vm8 = vcmask 7168  }
  0x44   :  { %v227_v39 = vadd.f32 %v219_v21, %v207_v19  ;;  %v247_v40 = vsel %vm246_vm4, %v245_v30, %v244_v26  ;;  %v251_v43 = vrot.slane %v226_v35, 2 }
  0x45   :  { %v250_v31 = vsel %vm249_vm5, %v248_v33, %v247_v40 }
  0x46   :  { %v253_v44 = vsel %vm252_vm6, %v251_v43, %v250_v31  ;;  %v254_v46 = vrot.slane %v227_v39, 1 }
  0x48   :  { %v256_v32 = vsel %vm255_vm7, %v254_v46, %v253_v44 }
  0x49   :  { %v258_v47 = vsel %vm41_vm0, %v256_v32, 0.0 }
  0x4a   :  { %259 = vadd.xlane.f32.xlu0 %v258_v47 }
  0xd7   :  { %v260_v48 = vpop.xlane.xlu0 %259 }
  0xd8   :  { %262 = vst.msk [vmem:[%s459_s2] sm:$0xff] %vm261_vm8, %v260_v48 }
  0xd9   :  { %267 = vsyncpa [#allocation3], 1 }

</bundles_post_ra>
